<compile_context>
chip_gen: v5e
topology: v5e:2x2
jax: 0.10.0
libtpu: 0.0.40
codegen_flags: <defaults>
</compile_context>

<pallas_src>
import math

import jax
import jax.numpy as jnp
from jax import lax
from jax.experimental import pallas as pl
from jax.experimental.pallas import tpu as pltpu

LN_EPS = 1e-12
_INV_SQRT2 = 1.0 / math.sqrt(2.0)


def _gelu_exact(x):
    # torch.nn.functional.gelu default: x * 0.5 * (1 + erf(x / sqrt(2)))
    return x * 0.5 * (1.0 + lax.erf(x * jnp.float32(_INV_SQRT2)))


def _round_up(x, m):
    return ((x + m - 1) // m) * m


def transform_kernel(x_ref, w_ref, b_ref, g_ref, beta_ref, o_ref):
    """One (tm, H) row tile: dense matmul -> bias_gelu -> LayerNorm affine."""
    h = jnp.dot(x_ref[...].astype(jnp.float32), w_ref[...],
                preferred_element_type=jnp.float32)
    h = _gelu_exact(h + b_ref[...])                         # bias_gelu
    mean = jnp.mean(h, axis=-1, keepdims=True)
    var = jnp.mean(jnp.square(h - mean), axis=-1, keepdims=True)
    h = (h - mean) * lax.rsqrt(var + jnp.float32(LN_EPS))
    o_ref[...] = (h * g_ref[...] + beta_ref[...]).astype(o_ref.dtype)


def bert_prediction_head_transform(hidden_states, params, *, tm=256):
    """hidden_states: [..., H]  ->  [..., H]   (dense + bias_gelu + LayerNorm)."""
    orig_shape = hidden_states.shape
    H = orig_shape[-1]
    x = hidden_states.reshape(-1, H)
    T = x.shape[0]

    # Row-tile size: multiple of 8 (sublane), no larger than the (rounded-up) token count.
    tm = max(8, min(int(tm), _round_up(T, 8)))
    tm = _round_up(tm, 8)
    T_pad = _round_up(T, tm)
    if T_pad != T:
        x = jnp.pad(x, ((0, T_pad - T), (0, 0)))
    grid = (T_pad // tm,)

    w = params["dense_w"]          # (H, H)   stored as (in, out) so kernel does x @ W
    b = params["dense_b"]          # (1, H)
    g = params["ln_g"]             # (1, H)
    beta = params["ln_b"]          # (1, H)

    # VMEM budget: double-buffered x/out row tiles + weight + biases, plus slack.
    needed = 4 * (2 * 2 * tm * H + 2 * H * H + 4 * H)
    vmem_limit = int(min(64 * 1024 * 1024, max(needed + (4 << 20), 32 << 20)))

    cost = pl.CostEstimate(
        flops=2 * T_pad * H * H + 10 * T_pad * H,
        transcendentals=T_pad * H,                 # erf
        bytes_accessed=4 * (2 * T_pad * H + H * H + 4 * H),
    )

    out = pl.pallas_call(
        transform_kernel,
        out_shape=jax.ShapeDtypeStruct((T_pad, H), hidden_states.dtype),
        grid=grid,
        in_specs=[
            pl.BlockSpec((tm, H), lambda i: (i, 0)),   # x row tile
            pl.BlockSpec((H, H), lambda i: (0, 0)),    # dense weight (resident)
            pl.BlockSpec((1, H), lambda i: (0, 0)),    # dense bias
            pl.BlockSpec((1, H), lambda i: (0, 0)),    # LN gamma
            pl.BlockSpec((1, H), lambda i: (0, 0)),    # LN beta
        ],
        out_specs=pl.BlockSpec((tm, H), lambda i: (i, 0)),
        compiler_params=pltpu.CompilerParams(
            dimension_semantics=("parallel",),         # independent row tiles -> megacore
            vmem_limit_bytes=vmem_limit,
        ),
        cost_estimate=cost,
    )(x, w, b, g, beta)

    if T_pad != T:
        out = out[:T]
    return out.reshape(orig_shape)


def _reference(hidden_states, params):
    h = hidden_states @ params["dense_w"] + params["dense_b"][0]
    h = _gelu_exact(h)
    mean = jnp.mean(h, axis=-1, keepdims=True)
    var = jnp.mean(jnp.square(h - mean), axis=-1, keepdims=True)
    h = (h - mean) * lax.rsqrt(var + LN_EPS)
    return h * params["ln_g"][0] + params["ln_b"][0]


if __name__ == "__main__":
    # Small shapes consistent with the module (batch=2, seq=8, hidden=128).
    B, S, H = 2, 8, 128

    key = jax.random.PRNGKey(0)
    ks = jax.random.split(key, 6)

    params = {
        # torch Linear weight is (out, in); stored here transposed as (in, out).
        "dense_w": jax.random.normal(ks[0], (H, H), jnp.float32) * 0.02,
        "dense_b": jax.random.normal(ks[1], (1, H), jnp.float32) * 0.02,
        # LayerNorm affine
        "ln_g": 1.0 + jax.random.normal(ks[2], (1, H), jnp.float32) * 0.02,
        "ln_b": jax.random.normal(ks[3], (1, H), jnp.float32) * 0.02,
    }

    hidden_states = jax.random.normal(ks[4], (B, S, H), jnp.float32)

    # tm=8 exercises the multi-tile grid path even at this tiny T = B*S = 16.
    out = bert_prediction_head_transform(hidden_states, params, tm=8)
    jax.block_until_ready(out)

    out_ref = _reference(hidden_states, params)
    assert out.shape == (B, S, H)
    assert jnp.allclose(out, out_ref, atol=1e-4, rtol=1e-4)

    print("KERNEL_OK")
</pallas_src>

<mosaic_0001>
module attributes {stable_mosaic.version = 11 : i64} {
  func.func @transform_kernel(%arg0: i32, %arg1: memref<8x128xf32, #tpu.memory_space<vmem>>, %arg2: memref<128x128xf32, #tpu.memory_space<vmem>>, %arg3: memref<1x128xf32, #tpu.memory_space<vmem>>, %arg4: memref<1x128xf32, #tpu.memory_space<vmem>>, %arg5: memref<1x128xf32, #tpu.memory_space<vmem>>, %arg6: memref<8x128xf32, #tpu.memory_space<vmem>>) attributes {dimension_semantics = [#tpu.dimension_semantics<parallel>], iteration_bounds = array<i64: 2>, scalar_prefetch = 0 : i64, scratch_operands = 0 : i64, tpu.core_type = #tpu.core_type<tc>, window_params = [{transform_indices = @transform_0, window_bounds = array<i64: 8, 128>}, {pipeline_mode = #tpu.pipeline_mode<synchronous>, transform_indices = @transform_1, window_bounds = array<i64: 128, 128>}, {pipeline_mode = #tpu.pipeline_mode<synchronous>, transform_indices = @transform_2, window_bounds = array<i64: 1, 128>}, {pipeline_mode = #tpu.pipeline_mode<synchronous>, transform_indices = @transform_3, window_bounds = array<i64: 1, 128>}, {pipeline_mode = #tpu.pipeline_mode<synchronous>, transform_indices = @transform_4, window_bounds = array<i64: 1, 128>}, {transform_indices = @transform_5, window_bounds = array<i64: 8, 128>}]} {
    %c0 = arith.constant 0 : index
    %c0_0 = arith.constant 0 : index
    %0 = vector.load %arg1[%c0, %c0_0] : memref<8x128xf32, #tpu.memory_space<vmem>>, vector<8x128xf32>
    %c0_1 = arith.constant 0 : index
    %c0_2 = arith.constant 0 : index
    %1 = vector.load %arg2[%c0_1, %c0_2] : memref<128x128xf32, #tpu.memory_space<vmem>>, vector<128x128xf32>
    %cst = arith.constant dense<0.000000e+00> : vector<8x128xf32>
    %2 = tpu.matmul %0, %1, %cst {dimension_numbers = #tpu.dot_dimension_numbers<[1], [0], [0], [1], [0, 0, 1, 1], [], []>} : vector<8x128xf32>, vector<128x128xf32>, vector<8x128xf32> -> vector<8x128xf32>
    %c0_3 = arith.constant 0 : index
    %c0_4 = arith.constant 0 : index
    %3 = vector.load %arg3[%c0_3, %c0_4] : memref<1x128xf32, #tpu.memory_space<vmem>>, vector<1x128xf32>
    %4 = vector.broadcast %3 : vector<1x128xf32> to vector<8x128xf32>
    %5 = arith.addf %2, %4 : vector<8x128xf32>
    %cst_5 = arith.constant 5.000000e-01 : f32
    %6 = vector.broadcast %cst_5 : f32 to vector<8x128xf32>
    %7 = arith.mulf %5, %6 : vector<8x128xf32>
    %cst_6 = arith.constant 0.707106769 : f32
    %8 = vector.broadcast %cst_6 : f32 to vector<8x128xf32>
    %9 = arith.mulf %5, %8 : vector<8x128xf32>
    %10 = math.erf %9 : vector<8x128xf32>
    %cst_7 = arith.constant 1.000000e+00 : f32
    %11 = vector.broadcast %cst_7 : f32 to vector<8x128xf32>
    %12 = arith.addf %11, %10 : vector<8x128xf32>
    %13 = arith.mulf %7, %12 : vector<8x128xf32>
    %cst_8 = arith.constant dense<0.000000e+00> : vector<8xf32>
    %14 = vector.multi_reduction <add>, %13, %cst_8 [1] : vector<8x128xf32> to vector<8xf32>
    %15 = vector.shape_cast %14 : vector<8xf32> to vector<8x1xf32>
    %cst_9 = arith.constant 1.280000e+02 : f32
    %16 = vector.broadcast %cst_9 : f32 to vector<8x1xf32>
    %17 = arith.divf %15, %16 : vector<8x1xf32>
    %18 = vector.broadcast %17 : vector<8x1xf32> to vector<8x128xf32>
    %19 = arith.subf %13, %18 : vector<8x128xf32>
    %20 = arith.mulf %19, %19 : vector<8x128xf32>
    %cst_10 = arith.constant dense<0.000000e+00> : vector<8xf32>
    %21 = vector.multi_reduction <add>, %20, %cst_10 [1] : vector<8x128xf32> to vector<8xf32>
    %22 = vector.shape_cast %21 : vector<8xf32> to vector<8x1xf32>
    %cst_11 = arith.constant 1.280000e+02 : f32
    %23 = vector.broadcast %cst_11 : f32 to vector<8x1xf32>
    %24 = arith.divf %22, %23 : vector<8x1xf32>
    %25 = vector.broadcast %17 : vector<8x1xf32> to vector<8x128xf32>
    %26 = arith.subf %13, %25 : vector<8x128xf32>
    %cst_12 = arith.constant 9.99999996E-13 : f32
    %27 = vector.broadcast %cst_12 : f32 to vector<8x1xf32>
    %28 = arith.addf %24, %27 : vector<8x1xf32>
    %29 = math.rsqrt %28 : vector<8x1xf32>
    %30 = vector.broadcast %29 : vector<8x1xf32> to vector<8x128xf32>
    %31 = arith.mulf %26, %30 : vector<8x128xf32>
    %c0_13 = arith.constant 0 : index
    %c0_14 = arith.constant 0 : index
    %32 = vector.load %arg4[%c0_13, %c0_14] : memref<1x128xf32, #tpu.memory_space<vmem>>, vector<1x128xf32>
    %33 = vector.broadcast %32 : vector<1x128xf32> to vector<8x128xf32>
    %34 = arith.mulf %31, %33 : vector<8x128xf32>
    %c0_15 = arith.constant 0 : index
    %c0_16 = arith.constant 0 : index
    %35 = vector.load %arg5[%c0_15, %c0_16] : memref<1x128xf32, #tpu.memory_space<vmem>>, vector<1x128xf32>
    %36 = vector.broadcast %35 : vector<1x128xf32> to vector<8x128xf32>
    %37 = arith.addf %34, %36 : vector<8x128xf32>
    %c0_17 = arith.constant 0 : index
    %c0_18 = arith.constant 0 : index
    %38 = vector.load %arg6[%c0_17, %c0_18] : memref<8x128xf32, #tpu.memory_space<vmem>>, vector<8x128xf32>
    tpu.vector_store %arg6[%c0_17, %c0_18], %37 {strides = array<i32>} : memref<8x128xf32, #tpu.memory_space<vmem>>, vector<8x128xf32>,
    return
  }
  func.func @transform_0(%arg0: i32) -> (i32, i32) {
    %c0_i32 = arith.constant 0 : i32
    %c0_i32_0 = arith.constant 0 : i32
    return %arg0, %c0_i32 : i32, i32
  }
  func.func @transform_1(%arg0: i32) -> (i32, i32) {
    %c0_i32 = arith.constant 0 : i32
    %c0_i32_0 = arith.constant 0 : i32
    %c0_i32_1 = arith.constant 0 : i32
    return %c0_i32, %c0_i32_0 : i32, i32
  }
  func.func @transform_2(%arg0: i32) -> (i32, i32) {
    %c0_i32 = arith.constant 0 : i32
    %c0_i32_0 = arith.constant 0 : i32
    %c0_i32_1 = arith.constant 0 : i32
    return %c0_i32, %c0_i32_0 : i32, i32
  }
  func.func @transform_3(%arg0: i32) -> (i32, i32) {
    %c0_i32 = arith.constant 0 : i32
    %c0_i32_0 = arith.constant 0 : i32
    %c0_i32_1 = arith.constant 0 : i32
    return %c0_i32, %c0_i32_0 : i32, i32
  }
  func.func @transform_4(%arg0: i32) -> (i32, i32) {
    %c0_i32 = arith.constant 0 : i32
    %c0_i32_0 = arith.constant 0 : i32
    %c0_i32_1 = arith.constant 0 : i32
    return %c0_i32, %c0_i32_0 : i32, i32
  }
  func.func @transform_5(%arg0: i32) -> (i32, i32) {
    %c0_i32 = arith.constant 0 : i32
    %c0_i32_0 = arith.constant 0 : i32
    return %arg0, %c0_i32 : i32, i32
  }
}

</mosaic_0001>

<bundles_post_ra>
// kernel: tpu_custom_call.1
= control target key start
LH: loop header
LB: loop body
LE: loop exit
PB: predicated region body
PF: predicated region fallthrough
CT: control target
= control target key end

     0   :  { %10 = vsyncpa [#allocation3], 0  ;;  %s880_s0 = inlined_call_operand.hbm [shape: f32[16,128], index: 0, kind: input, shape index: {}]   ;;  %s881_s1 = inlined_call_operand.hbm [shape: f32[128,128], index: 1, kind: input, shape index: {}]   ;;  %s882_s2 = inlined_call_operand.vmem [shape: f32[1,128], index: 2, kind: input, shape index: {}]   ;;  %s883_s3 = inlined_call_operand.vmem [shape: f32[1,128], index: 3, kind: input, shape index: {}]   ;;  %s884_s4 = inlined_call_operand.vmem [shape: f32[1,128], index: 4, kind: input, shape index: {}]   ;;  %s885_s5 = inlined_call_operand.hbm [shape: f32[16,128], index: 5, kind: output, shape index: {}]  }
   0x1   :  { %12 = vsyncpa [#allocation3 + $0x1], 0 }
   0x2   :  { %13 = vsyncpa [#allocation6], 0 }
   0x3   :  { %14 = vsyncpa [#allocation4], 0 }
   0x4   :  { %16 = vsyncpa [#allocation4 + $0x1], 0  ;;  %s728_s18 = smov 0   ;;  %s730_s19 = smov 0  }
   0x5   :  { %s732_s20 = smov 0   ;;  %s734_s21 = smov 0  }
   0x6 LB: > { %s174_s24 = sshll.u32 %s881_s1, 4  ;;  %s752_s25 = sadd.s32 4294967295, %s692_s21   ;;  %s692_s21 = sphi %s734_s21, %s895_s21   ;;  %s688_s20 = sphi %s732_s20, %s894_s20   ;;  %s684_s19 = sphi %s730_s19, %s893_s19   ;;  %s680_s18 = sphi %s728_s18, %s892_s18   ;;  %s175_s24 = int_to_ptr.hbm [resolvable:$true] %s174_s24 }
   0x7   : > { %p479_p0 = scmp.ge.s32.totalorder %s692_s21, 1  ;;  %p43_p1 = scmp.eq.s32.totalorder %s752_s25, 0 }
   0x8   : > { %p163_p2 = scmp.lt.s32.totalorder %s692_s21, 3  ;;  %s694_s27 = smov [#allocation5]  }
   0x9   : > { %s176_s28 = sshll.u32 %s694_s27, 4  ;;  %s695_s29 = smov 128   ;;  %s177_s28 = int_to_ptr.vmem [resolvable:$true] %s176_s28 }
   0xa   : > { %p757_p3 = pnand %p479_p0, %p163_p2  ;;  %s696_s30 = smov 8  }
   0xb   : > { %s478_s6 = sadd.s32 4294967294, %s692_s21   ;;  %s768_s7 = sadd.s32 1, %s692_s21  }
   0xc   : > { %p501_p4 = pneg %p757_p3  ;;  %s29_s8 = sadd.s32 1, %s688_s20 }
   0xd   : > { %s26_s9 = ssub.s32 %s692_s21, %s768_s7  ;;  %p36_p7 = scmp.ne.s32.totalorder %s688_s20, %s684_s19 }
   0xe   : > { %p502_p6 = pnand %p501_p4, %p43_p1  ;;  %p27_p8 = scmp.eq.s32.totalorder %s26_s9, 0 }
   0xf   : > { %p37_p9 = scmp.eq.s32.totalorder %s692_s21, 0  ;;  %p42_p10 = scmp.ne.s32.totalorder %s684_s19, %s680_s18 }
  0x10   : > { %504 = dma.hbm_to_vmem [thread:$0]  (!%p502_p6), %s175_s24, 2048, %s177_s28, [#allocation6], %s695_s29, %s695_s29, %s696_s30  }
  0x11   : > { %p150_p11 = scmp.eq.s32.totalorder %s752_s25, 1  ;;  %p784_p12 = por %p43_p1, %p42_p10 }
  0x12   : > { %s780_s10 = scalar_select %p27_p8, %s688_s20, %s29_s8  }
  0x13   : > { %p788_p13 = por %p150_p11, %p36_p7  ;;  %p156_p0 = scmp.eq.s32.totalorder %s478_s6, 1 }
  0x14   : > { %p38_p2 = por %p37_p9, %p36_p7  ;;  %s199_s13 = sand.u32 1, %s688_s20  }
  0x15   : > { %p793_p4 = por %p156_p0, %p42_p10  ;;  %p514_p6 = scmp.lt.s32.totalorder %s692_s21, 2 }
  0x16   : > { %s482_s15 = sshll.u32 %s199_s13, 3  ;;  %s483_s16 = sshll.u32 %s692_s21, 3 }
  0x17   : > { %s207_s23 = scalar_lea.hbm %s880_s0, %s483_s16  ;;  %s203_s27 = scalar_lea.vmem [#allocation2], %s482_s15 }
  0x18   : > { %s209_s24 = sshll.u32 %s207_s23, 4  ;;  %s211_s28 = sshll.u32 %s203_s27, 4  ;;  %s210_s24 = int_to_ptr.hbm [resolvable:$true] %s209_s24  ;;  %s212_s28 = int_to_ptr.vmem [resolvable:$true] %s211_s28 }
  0x19   : > { %p802_p8 = pnand %p514_p6, %p38_p2  ;;  %s200_s30 = scalar_lea.sflag [#allocation3], %s199_s13 }
  0x1a   : > { %s592_s6 = sshra.s32 %s210_s24, 4  ;;  %s599_s15 = scalar_lea.hbm %s880_s0, 16  ;;  %s593_s6 = int_to_ptr.hbm [resolvable:$true] %s592_s6 }
  0x1b   : > { %s594_s8 = scalar_lea.hbm %s593_s6, 8  ;;  %p596_p9 = pneg %p802_p8 }
  0x1c   : > { %p595_p7 = scmp.ne.s32.totalorder %s593_s6, %s594_s8  ;;  %p600_p0 = scmp.lt.s32.totalorder %s593_s6, %s880_s0 }
  0x1d   : > { %p601_p2 = scmp.lt.s32.totalorder %s599_s15, %s594_s8 }
  0x1e   : > { %p597_p10 = pnand %p596_p9, %p595_p7 }
  0x1f   : > { %p602_p6 = por %p601_p2, %p600_p0 }
  0x20   : > { %p598_p11 = pneg %p597_p10 }
  0x22   : > { %p603_p5 = pnand %p602_p6, %p598_p11 }
  0x24   : > { %606 = shalt.err (!%p603_p5)
}
  0x25   : > { %508 = dma.hbm_to_vmem [thread:$0]  (!%p802_p8), %s210_s24, 128, %s212_s28, %s200_s30  }
  0x26   : > { %220 = sbr.rel (%p757_p3) target bundleno = 526 (0x20e), region = 40  ;;  %s819_s13 = sand.u32 (!%p757_p3), 1, %s684_s19  }
  0x27   : > { %s485_s23 = sshll.u32 (!%p757_p3), %s819_s13, 3  ;;  %s223_s27 = scalar_lea.sflag (!%p757_p3), [#allocation3], %s819_s13 }
  0x28   : > { %s825_s6 = scalar_lea.vmem (!%p757_p3), [#allocation2], %s485_s23 }
  0x2b   : > { %667 = dma.done.wait (%p784_p12), %s223_s27, 128  }
  0x2c   : > { %669 = vsyncadd (%p784_p12), %s223_s27, 4294967168 }
  0x2d   : > { %671 = dma.done.wait (%p43_p1), [#allocation6], 2048  }
  0x2e   : > { %673 = vsyncadd (%p43_p1), [#allocation6], 4294965248  ;;  %v275_v0 = vld [vmem:[#allocation5 + $0x78] sm:$0xff]  ;;  %v274_v1 = vld [vmem:[#allocation5 + $0x70] sm:$0xff]  ;;  %v697_v59 = vmov 128.0   ;;  %s490_s24 = sshll.u32 %s752_s25, 3 }
  0x2f   : > { %280 = vmatpush.msra.mxu0 %v275_v0  ;;  %v273_v2 = vld [vmem:[#allocation5 + $0x68] sm:$0xff]  ;;  %v272_v3 = vld [vmem:[#allocation5 + $0x60] sm:$0xff]  ;;  %v271_v4 = vld [vmem:[#allocation5 + $0x58] sm:$0xff]  ;;  %s393_s9 = scalar_lea.hbm %s885_s5, %s490_s24  ;;  %s258_s25 = scalar_lea.vmem [#allocation7], %s485_s23 }
  0x30   : > { %v270_v5 = vld [vmem:[#allocation5 + $0x50] sm:$0xff]  ;;  %v269_v6 = vld [vmem:[#allocation5 + $0x48] sm:$0xff]  ;;  %v268_v7 = vld [vmem:[#allocation5 + $0x40] sm:$0xff]  ;;  %s395_s17 = sshll.u32 %s258_s25, 4  ;;  %s397_s22 = sshll.u32 %s393_s9, 4  ;;  %s396_s17 = int_to_ptr.vmem [resolvable:$true] %s395_s17  ;;  %s398_s22 = int_to_ptr.hbm [resolvable:$true] %s397_s22 }
  0x31   : > { %281 = vmatpush.msra.mxu0 %v274_v1  ;;  %v267_v8 = vld [vmem:[#allocation5 + $0x38] sm:$0xff]  ;;  %v266_v9 = vld [vmem:[#allocation5 + $0x30] sm:$0xff]  ;;  %v265_v10 = vld [vmem:[#allocation5 + $0x28] sm:$0xff]  ;;  %s383_s27 = scalar_lea.sflag [#allocation4], %s819_s13  ;;  %s642_s28 = scalar_lea.hbm %s885_s5, 16 }
  0x32   : > { %v264_v11 = vld [vmem:[#allocation5 + $0x20] sm:$0xff]  ;;  %v263_v12 = vld [vmem:[#allocation5 + $0x18] sm:$0xff]  ;;  %v262_v13 = vld [vmem:[#allocation5 + $0x10] sm:$0xff] }
  0x33   : > { %282 = vmatpush.msra.mxu0 %v273_v2  ;;  %v261_v14 = vld [vmem:[#allocation5 + $0x8] sm:$0xff]  ;;  %v260_v15 = vld [vmem:[#allocation5] sm:$0xff]  ;;  %v259_v16 = vld [vmem:[%s825_s6] sm:$0xff]  ;;  %s636_s6 = sshra.s32 %s398_s22, 4  ;;  %s637_s6 = int_to_ptr.hbm [resolvable:$true] %s636_s6 }
  0x34   : > { %v553_v17 = vld [vmem:[%s882_s2] ss:$0 sm:$0xff]  ;;  %s638_s26 = scalar_lea.hbm %s637_s6, 8  ;;  %p643_p12 = scmp.lt.s32.totalorder %s637_s6, %s885_s5 }
  0x35   : > { %283 = vmatpush.msra.mxu0 %v272_v3  ;;  %p639_p1 = scmp.ne.s32.totalorder %s637_s6, %s638_s26  ;;  %p644_p8 = scmp.lt.s32.totalorder %s642_s28, %s638_s26 }
  0x37   : > { %284 = vmatpush.msra.mxu0 %v271_v4  ;;  %p640_p3 = pnand %p639_p1, %p788_p13  ;;  %p645_p7 = por %p644_p8, %p643_p12 }
  0x39   : > { %285 = vmatpush.msra.mxu0 %v270_v5  ;;  %p641_p5 = pneg %p640_p3 }
  0x3b   : > { %286 = vmatpush.msra.mxu0 %v269_v6  ;;  %p646_p9 = pnand %p645_p7, %p641_p5 }
  0x3d   : > { %287 = vmatpush.msra.mxu0 %v268_v7 }
  0x3f   : > { %288 = vmatpush.msra.mxu0 %v267_v8 }
  0x41   : > { %289 = vmatpush.msra.mxu0 %v266_v9 }
  0x43   : > { %290 = vmatpush.msra.mxu0 %v265_v10 }
  0x45   : > { %291 = vmatpush.msra.mxu0 %v264_v11 }
  0x47   : > { %292 = vmatpush.msra.mxu0 %v263_v12 }
  0x49   : > { %293 = vmatpush.msra.mxu0 %v262_v13 }
  0x4b   : > { %294 = vmatpush.msra.mxu0 %v261_v14 }
  0x4d   : > { %295 = vmatpush.msra.mxu0 %v260_v15  ;;  %v554_v15 = vld [vmem:[%s883_s3] ss:$0 sm:$0xff] }
  0x4e   : > { %296 = vmatmul.f32.vlgmr.msra.gmra.mxu0 %v259_v16 }
  0xcb   : > { %v297_v18 = vpop.f32.mrf.mxu0 }
  0xcc   : > { %v298_v19 = vadd.f32 %v553_v17, %v297_v18  ;;  %v555_v18 = vld [vmem:[%s884_s4] ss:$0 sm:$0xff] }
  0xce   : > { %v301_v20 = vmul.f32 0.70710677, %v298_v19  ;;  %v300_v56 = vmul.f32 0.5, %v298_v19 }
  0xd0   : > { %v302_v21 = vmul.f32 %v301_v20, %v301_v20 }
  0xd2   : > { %v303_v22 = vmin.f32 %v302_v21, 16.0 }
  0xd4   : > { %v304_v23 = vmul.f32 2.1237322e-06, %v303_v22  ;;  %v315_v24 = vmul.f32 3.8918573e-05, %v303_v22 }
  0xd6   : > { %v305_v25 = vadd.f32 0.00028619796, %v304_v23  ;;  %v316_v26 = vadd.f32 0.001143296, %v315_v24 }
  0xd8   : > { %v306_v27 = vmul.f32 %v305_v25, %v303_v22  ;;  %v317_v28 = vmul.f32 %v316_v26, %v303_v22 }
  0xda   : > { %v318_v29 = vadd.f32 0.014752088, %v317_v28  ;;  %v307_v30 = vadd.f32 0.0036580483, %v306_v27 }
  0xdc   : > { %v319_v31 = vmul.f32 %v318_v29, %v303_v22  ;;  %v308_v33 = vmul.f32 %v307_v30, %v303_v22 }
  0xde   : > { %v320_v32 = vadd.f32 0.112945676, %v319_v31  ;;  %v309_v36 = vadd.f32 0.05243302, %v308_v33 }
  0xe0   : > { %v321_v34 = vmul.f32 %v320_v32, %v303_v22  ;;  %v310_v39 = vmul.f32 %v309_v36, %v303_v22 }
  0xe2   : > { %v322_v35 = vadd.f32 0.4994258, %v321_v34  ;;  %v311_v40 = vadd.f32 0.18741608, %v310_v39 }
  0xe4   : > { %v323_v37 = vmul.f32 %v322_v35, %v303_v22  ;;  %v312_v42 = vmul.f32 %v311_v40, %v303_v22 }
  0xe6   : > { %v324_v38 = vadd.f32 1.0, %v323_v37  ;;  %v313_v46 = vadd.f32 1.1283791, %v312_v42 }
  0xe8   : > { %556 = vrcp.f32 %v324_v38  ;;  %v336_v45 = vand.u32 2147483648, %v324_v38  ;;  %v334_v48 = vand.u32 2147483647, %v324_v38  ;;  %vm330_vm1 = vweird.f32 %v324_v38 }
  0xe9   : > { %v314_v51 = vmul.f32 %v313_v46, %v301_v20  ;;  %558 = vrcp.f32 %v697_v59 }
  0xea   : > { %v337_v50 = vor.u32 1.1754944e-38, %v336_v45  ;;  %vm335_vm3 = vcmp.eq.f32.partialorder %v334_v48, 8.507059e+37 }
  0xee   : > { %v557_v41 = vpop.eup %556 }
  0xef   : > { %v326_v43 = vmul.f32 %v557_v41, %v324_v38  ;;  %vm331_vm0 = vweird.f32 %v557_v41  ;;  %v559_v60 = vpop.eup %558 }
  0xf0   : > { %vm332_vm2 = vmor %vm330_vm1, %vm331_vm0  ;;  %v347_v61 = vmul.f32 128.0, %v559_v60  ;;  %vm351_vm4 = vweird.f32 %v559_v60 }
  0xf1   : > { %v327_v44 = vsub.f32 1.0, %v326_v43 }
  0xf2   : > { %v348_v62 = vsub.f32 1.0, %v347_v61 }
  0xf3   : > { %v328_v47 = vmul.f32 %v557_v41, %v327_v44 }
  0xf4   : > { %v349_v63 = vmul.f32 %v559_v60, %v348_v62 }
  0xf5   : > { %v329_v49 = vadd.f32 %v557_v41, %v328_v47 }
  0xf6   : > { %v350_v0 = vadd.f32 %v559_v60, %v349_v63 }
  0xf7   : > { %v333_v52 = vsel %vm332_vm2, %v557_v41, %v329_v49 }
  0xf8   : > { %v338_v53 = vsel %vm335_vm3, %v337_v50, %v333_v52  ;;  %v352_v1 = vsel %vm351_vm4, %v559_v60, %v350_v0 }
  0xf9   : > { %v339_v54 = vmul.f32 %v338_v53, %v314_v51 }
  0xfb   : > { %v488_v55 = vclamps-f32 %v339_v54, 1.0 }
  0xfd   : > { %v342_v57 = vadd.f32 1.0, %v488_v55 }
  0xff   : > { %v343_v58 = vmul.f32 %v342_v57, %v300_v56 }
 0x101   : > { %344 = vadd.xlane.f32.xlu0 %v343_v58 }
 0x174   : > { %v345_v2 = vpop.xlane.xlu0 %344 }
 0x175   : > { %v353_v3 = vmul.f32 %v352_v1, %v345_v2 }
 0x177   : > { %v354_v4 = vsub.f32 %v343_v58, %v353_v3 }
 0x179   : > { %v355_v5 = vmul.f32 %v354_v4, %v354_v4 }
 0x17b   : > { %356 = vadd.xlane.f32.xlu0 %v355_v5 }
 0x1ee   : > { %v357_v6 = vpop.xlane.xlu0 %356 }
 0x1ef   : > { %v358_v7 = vmul.f32 %v357_v6, %v352_v1 }
 0x1f1   : > { %v359_v8 = vadd.f32 1e-12, %v358_v7 }
 0x1f3   : > { %560 = vrsqrt.f32 %v359_v8  ;;  %vm366_vm6 = vweird.f32 %v359_v8 }
 0x1f9   : > { %v561_v9 = vpop.eup %560 }
 0x1fa   : > { %v361_v10 = vmul.f32 %v561_v9, %v359_v8  ;;  %vm367_vm5 = vweird.f32 %v561_v9 }
 0x1fb   : > { %vm368_vm7 = vmor %vm366_vm6, %vm367_vm5 }
 0x1fc   : > { %v362_v11 = vmul.f32 %v561_v9, %v361_v10 }
 0x1fe   : > { %v363_v12 = vmul.f32 0.5, %v362_v11 }
 0x200   : > { %v364_v13 = vsub.f32 1.5, %v363_v12 }
 0x202   : > { %v365_v14 = vmul.f32 %v561_v9, %v364_v13 }
 0x204   : > { %v369_v16 = vsel %vm368_vm7, %v561_v9, %v365_v14 }
 0x205   : > { %v370_v17 = vmul.f32 %v369_v16, %v354_v4 }
 0x207   : > { %v375_v19 = vmul.f32 %v554_v15, %v370_v17 }
 0x209   : > { %v380_v20 = vadd.f32 %v555_v18, %v375_v19 }
 0x20b   : > { %381 = vst [vmem:[%s258_s25] sm:$0xff] %v380_v20 }
 0x20c   : > { %649 = shalt.err (!%p646_p9)
}
 0x20d   : > { %499 = dma.vmem_to_hbm [thread:$0]  (%p788_p13), %s396_s17, 128, %s398_s22, %s383_s27  }
 0x20e PF: > { %s409_s13 = sand.u32 1, %s680_s18   ;;  %p891_p10 = scmp.ge.s32.totalorder %s692_s21, 2 }
 0x20f   : > { %s410_s30 = scalar_lea.sflag [#allocation4], %s409_s13 }
 0x210   : > { %p510_p11 = pnand %p891_p10, %p793_p4 }
 0x212   : > { %p511_p0 = pneg %p510_p11 }
 0x214   : > { %675 = dma.done.wait (%p511_p0), %s410_s30, 128  }
 0x215   : > { %677 = vsyncadd (%p511_p0), %s410_s30, 4294967168  ;;  %p19_p2 = scmp.ge.s32.totalorder %s768_s7, 4   ;;  %s892_s18 = smov %s684_s19 }
 0x216   : > { %s893_s19 = smov %s688_s20  ;;  %s894_s20 = smov %s780_s10 }
 0x217   : > { %s895_s21 = smov %s768_s7  ;;  %21 = sbr.rel (!%p19_p2) target bundleno = 6 (0x6), region = 89 }
 0x21c   :  { %416 = vsyncpa [#allocation3], 1 }
 0x21d   :  { %418 = vsyncpa [#allocation3 + $0x1], 1 }
 0x21e   :  { %419 = vsyncpa [#allocation6], 1 }
 0x21f   :  { %420 = vsyncpa [#allocation4], 1 }
 0x220   :  { %422 = vsyncpa [#allocation4 + $0x1], 1 }

</bundles_post_ra>
